<compile_context>
chip_gen: v7x
topology: tpu7x:2x2x1
jax: 0.10.0
libtpu: 0.0.40
codegen_flags: <defaults>
</compile_context>

<pallas_src>
import functools

import jax
import jax.numpy as jnp
from jax.experimental import pallas as pl
from jax.experimental.pallas import tpu as pltpu

BN_EPS = 1e-5
PACK = 8                  # samples packed per lane-dense row (8*16 = 128 lanes)
DEFAULT_TILE_B = 16384    # samples per grid step (= 2048 packed rows, ~13 MiB VMEM)
                          # per-generation tuning: v5e/v6e 16384, v7x 32768.


def _round_up(n, m):
    return ((n + m - 1) // m) * m


# ---------------------------------------------------------------------------
# Kernel: packed Linear1 + ReLU + (BN/Dropout folded away) + Linear2 + ReLU
#   xp_ref : (tile_p, PACK*in)    f32, 8 samples per row
#   w1_ref : (PACK*in, PACK*hid)  matmul dtype, kron(I_8, w1)
#   b1_ref : (1, PACK*hid)        f32, b1 tiled 8x
#   w2_ref : (PACK*hid, PACK*out) matmul dtype, kron(I_8, BN-folded w2)
#   b2_ref : (1, PACK*out)        f32, folded b2 tiled 8x
#   out_ref: (tile_p, PACK*out)   f32, 8 samples per row (row-major == (B,out))
# ---------------------------------------------------------------------------
def digitalnn_kernel(xp_ref, w1_ref, b1_ref, w2_ref, b2_ref, out_ref):
    mm_dtype = w1_ref.dtype

    # Linear(in, hidden) + ReLU  (on 8 packed samples per row)
    h = jnp.dot(xp_ref[...].astype(mm_dtype), w1_ref[...],
                preferred_element_type=jnp.float32)
    h = jnp.maximum(h + b1_ref[...], 0.0)

    # BatchNorm1d(hidden) [eval] folded into w2/b2; Dropout(0.3) is identity.

    # Linear(hidden, out) + ReLU  -> lane-dense 128-wide output rows
    o = jnp.dot(h.astype(mm_dtype), w2_ref[...],
                preferred_element_type=jnp.float32)
    out_ref[...] = jnp.maximum(o + b2_ref[...], 0.0)


# ---------------------------------------------------------------------------
# Wrapper
# ---------------------------------------------------------------------------
def digitalnn_forward(x, folded, tile_b=DEFAULT_TILE_B):
    """x: (B, input_size) f32.  folded: output of fold_params()."""
    w1, b1, w2, b2 = folded["w1"], folded["b1"], folded["w2"], folded["b2"]
    B, in_size = x.shape
    assert w1.shape[0] == PACK * in_size, "folded params do not match input size"
    hid_pk = w1.shape[1]                  # PACK * hidden
    out_pk = w2.shape[1]                  # PACK * out
    out_size = out_pk // PACK

    # Pack 8 samples per row.  For B % 8 == 0 this is a free row-major bitcast;
    # otherwise pad with up to 7 zero rows (one small copy) and slice back.
    B8 = _round_up(B, PACK)
    xw = jnp.pad(x, ((0, B8 - B), (0, 0))) if B8 != B else x
    P = B8 // PACK
    xp = xw.reshape(P, PACK * in_size)

    # Packed-row tile: either the whole array (small batch, block dim == full
    # dim is always legal) or a multiple of 8 sublanes; the ragged last grid
    # block is masked by Pallas, so no padding to a tile multiple is needed.
    tile_p_req = max(8, _round_up(max(tile_b, PACK) // PACK, 8))
    tile_p = P if P <= tile_p_req else tile_p_req
    grid = (pl.cdiv(P, tile_p),)

    out_p = pl.pallas_call(
        digitalnn_kernel,
        out_shape=jax.ShapeDtypeStruct((P, out_pk), jnp.float32),
        grid_spec=pltpu.PrefetchScalarGridSpec(
            num_scalar_prefetch=0,
            grid=grid,
            in_specs=[
                # activations: tiled over the batch (auto double-buffered)
                pl.BlockSpec((tile_p, PACK * in_size), lambda i: (i, 0)),
                # weights / biases: pinned resident across all grid steps
                pl.BlockSpec((PACK * in_size, hid_pk), lambda i: (0, 0)),
                pl.BlockSpec((1, hid_pk), lambda i: (0, 0)),
                pl.BlockSpec((hid_pk, out_pk), lambda i: (0, 0)),
                pl.BlockSpec((1, out_pk), lambda i: (0, 0)),
            ],
            out_specs=pl.BlockSpec((tile_p, out_pk), lambda i: (i, 0)),
        ),
        compiler_params=pltpu.CompilerParams(
            dimension_semantics=("parallel",),   # megacore split on multi-TC parts
            vmem_limit_bytes=32 * 1024 * 1024,   # accept the large batch tiles
        ),
    )(xp, w1, b1, w2, b2)

    out = out_p.reshape(B8, out_size)    # free: row-major bitcast back to (B8, 16)
    return out[:B] if B8 != B else out


# ---------------------------------------------------------------------------
# Parameter handling
# ---------------------------------------------------------------------------
def init_params(key, input_size, hidden_size=32, output_size=16):
    """Raw parameters mirroring the PyTorch module (weights pre-transposed to
    (in_features, out_features) so the math is plain x @ W)."""
    k1, k2, k3, k4, k5, k6, k7, k8 = jax.random.split(key, 8)
    lim1 = 1.0 / jnp.sqrt(jnp.float32(input_size))
    lim2 = 1.0 / jnp.sqrt(jnp.float32(hidden_size))
    w1 = jax.random.uniform(k1, (input_size, hidden_size), jnp.float32, -lim1, lim1)
    b1 = jax.random.uniform(k2, (1, hidden_size), jnp.float32, -lim1, lim1)
    w2 = jax.random.uniform(k3, (hidden_size, output_size), jnp.float32, -lim2, lim2)
    b2 = jax.random.uniform(k4, (1, output_size), jnp.float32, -lim2, lim2)
    # Non-trivial BatchNorm state to exercise the fold (PyTorch defaults would
    # be gamma=1, beta=0, mean=0, var=1).
    gamma = jax.random.uniform(k5, (1, hidden_size), jnp.float32, 0.5, 1.5)
    beta = 0.1 * jax.random.normal(k6, (1, hidden_size), jnp.float32)
    mean = 0.1 * jax.random.normal(k7, (1, hidden_size), jnp.float32)
    var = jax.random.uniform(k8, (1, hidden_size), jnp.float32, 0.5, 1.5)
    return {"w1": w1, "b1": b1, "gamma": gamma, "beta": beta,
            "mean": mean, "var": var, "w2": w2, "b2": b2}


def fold_params(p, matmul_dtype=jnp.bfloat16):
    """Fold eval-mode BatchNorm into Linear2 (exact, in f32), then expand both
    Linears to the lane-dense packed form: block-diagonal weights kron(I_8, W)
    and 8x-tiled biases.  matmul_dtype controls only the MXU multiplicand
    precision (accumulation, biases and ReLU stay f32)."""
    s = p["gamma"] * jax.lax.rsqrt(p["var"] + BN_EPS)          # (1, hidden)
    w2_f = s.reshape(-1, 1) * p["w2"]                           # (hidden, out)
    b2_f = p["b2"] + (p["beta"] - p["mean"] * s) @ p["w2"]      # (1, out)

    eye = jnp.eye(PACK, dtype=jnp.float32)
    return {
        "w1": jnp.kron(eye, p["w1"]).astype(matmul_dtype),      # (8*in, 8*hid)
        "b1": jnp.tile(p["b1"], (1, PACK)),                     # (1, 8*hid) f32
        "w2": jnp.kron(eye, w2_f).astype(matmul_dtype),         # (8*hid, 8*out)
        "b2": jnp.tile(b2_f, (1, PACK)),                        # (1, 8*out) f32
    }


def reference_forward(x, p):
    """Unfolded, full-f32 eval-mode reference (matches PyTorch semantics)."""
    h = jnp.maximum(x @ p["w1"] + p["b1"], 0.0)
    h = (h - p["mean"]) * jax.lax.rsqrt(p["var"] + BN_EPS) * p["gamma"] + p["beta"]
    # Dropout(0.3): identity in eval mode.
    return jnp.maximum(h @ p["w2"] + p["b2"], 0.0)


# ---------------------------------------------------------------------------
if __name__ == "__main__":
    key = jax.random.PRNGKey(0)
    kx1, kx2, kx3, kp = jax.random.split(key, 4)

    input_size, hidden_size, output_size = 24, 32, 16
    params = init_params(kp, input_size, hidden_size, output_size)
    folded = fold_params(params)                 # bf16 MXU multiplicands (default)

    fwd = jax.jit(functools.partial(digitalnn_forward, tile_b=DEFAULT_TILE_B))

    # bf16 multiplicands (f32 accumulate) vs full-f32 reference -> bf16-level tol.
    tol = dict(atol=3e-2, rtol=3e-2)

    # Test 1: B % 8 == 0, single grid step (zero-copy pack/unpack path).
    x1 = jax.random.normal(kx1, (64, input_size), jnp.float32)
    out1 = fwd(x1, folded)
    jax.block_until_ready(out1)
    assert out1.shape == (64, output_size)
    assert jnp.allclose(out1, reference_forward(x1, params), **tol)

    # Test 2: several grid steps with a ragged last block (no padding passes).
    x2 = jax.random.normal(kx2, (200, input_size), jnp.float32)
    out2 = digitalnn_forward(x2, folded, tile_b=64)   # 8 packed rows per step
    jax.block_until_ready(out2)
    assert out2.shape == (200, output_size)
    assert jnp.allclose(out2, reference_forward(x2, params), **tol)

    # Test 3: B % 8 != 0 -> small pad/slice fallback path.
    x3 = jax.random.normal(kx3, (20, input_size), jnp.float32)
    out3 = digitalnn_forward(x3, folded, tile_b=64)
    jax.block_until_ready(out3)
    assert out3.shape == (20, output_size)
    assert jnp.allclose(out3, reference_forward(x3, params), **tol)

    # Test 4: exact-f32 matmul path -> tight check of the packing/fold algebra.
    folded_f32 = fold_params(params, matmul_dtype=jnp.float32)
    out4 = digitalnn_forward(x1, folded_f32)
    jax.block_until_ready(out4)
    assert jnp.allclose(out4, reference_forward(x1, params), atol=1e-4, rtol=1e-4)

    print("KERNEL_OK")
</pallas_src>

<mosaic_0001>
module attributes {stable_mosaic.version = 11 : i64} {
  func.func @digitalnn_kernel(%arg0: i32, %arg1: memref<8x192xf32, #tpu.memory_space<vmem>>, %arg2: memref<192x256xbf16, #tpu.memory_space<vmem>>, %arg3: memref<1x256xf32, #tpu.memory_space<vmem>>, %arg4: memref<256x128xbf16, #tpu.memory_space<vmem>>, %arg5: memref<1x128xf32, #tpu.memory_space<vmem>>, %arg6: memref<8x128xf32, #tpu.memory_space<vmem>>) attributes {dimension_semantics = [#tpu.dimension_semantics<parallel>], iteration_bounds = array<i64: 1>, scalar_prefetch = 0 : i64, scratch_operands = 0 : i64, tpu.core_type = #tpu.core_type<tc>, window_params = [{transform_indices = @transform_0, window_bounds = array<i64: 8, 192>}, {pipeline_mode = #tpu.pipeline_mode<synchronous>, transform_indices = @transform_1, window_bounds = array<i64: 192, 256>}, {pipeline_mode = #tpu.pipeline_mode<synchronous>, transform_indices = @transform_2, window_bounds = array<i64: 1, 256>}, {pipeline_mode = #tpu.pipeline_mode<synchronous>, transform_indices = @transform_3, window_bounds = array<i64: 256, 128>}, {pipeline_mode = #tpu.pipeline_mode<synchronous>, transform_indices = @transform_4, window_bounds = array<i64: 1, 128>}, {transform_indices = @transform_5, window_bounds = array<i64: 8, 128>}]} {
    %c0 = arith.constant 0 : index
    %c0_0 = arith.constant 0 : index
    %0 = vector.load %arg1[%c0, %c0_0] : memref<8x192xf32, #tpu.memory_space<vmem>>, vector<8x192xf32>
    %1 = arith.truncf %0 : vector<8x192xf32> to vector<8x192xbf16>
    %c0_1 = arith.constant 0 : index
    %c0_2 = arith.constant 0 : index
    %2 = vector.load %arg2[%c0_1, %c0_2] : memref<192x256xbf16, #tpu.memory_space<vmem>>, vector<192x256xbf16>
    %cst = arith.constant dense<0.000000e+00> : vector<8x256xf32>
    %3 = tpu.matmul %1, %2, %cst {dimension_numbers = #tpu.dot_dimension_numbers<[1], [0], [0], [1], [0, 0, 1, 1], [], []>} : vector<8x192xbf16>, vector<192x256xbf16>, vector<8x256xf32> -> vector<8x256xf32>
    %c0_3 = arith.constant 0 : index
    %c0_4 = arith.constant 0 : index
    %4 = vector.load %arg3[%c0_3, %c0_4] : memref<1x256xf32, #tpu.memory_space<vmem>>, vector<1x256xf32>
    %5 = vector.broadcast %4 : vector<1x256xf32> to vector<8x256xf32>
    %6 = arith.addf %3, %5 : vector<8x256xf32>
    %cst_5 = arith.constant 0.000000e+00 : f32
    %7 = vector.broadcast %cst_5 : f32 to vector<8x256xf32>
    %8 = arith.maximumf %6, %7 : vector<8x256xf32>
    %9 = arith.truncf %8 : vector<8x256xf32> to vector<8x256xbf16>
    %c0_6 = arith.constant 0 : index
    %c0_7 = arith.constant 0 : index
    %10 = vector.load %arg4[%c0_6, %c0_7] : memref<256x128xbf16, #tpu.memory_space<vmem>>, vector<256x128xbf16>
    %cst_8 = arith.constant dense<0.000000e+00> : vector<8x128xf32>
    %11 = tpu.matmul %9, %10, %cst_8 {dimension_numbers = #tpu.dot_dimension_numbers<[1], [0], [0], [1], [0, 0, 1, 1], [], []>} : vector<8x256xbf16>, vector<256x128xbf16>, vector<8x128xf32> -> vector<8x128xf32>
    %c0_9 = arith.constant 0 : index
    %c0_10 = arith.constant 0 : index
    %12 = vector.load %arg5[%c0_9, %c0_10] : memref<1x128xf32, #tpu.memory_space<vmem>>, vector<1x128xf32>
    %13 = vector.broadcast %12 : vector<1x128xf32> to vector<8x128xf32>
    %14 = arith.addf %11, %13 : vector<8x128xf32>
    %cst_11 = arith.constant 0.000000e+00 : f32
    %15 = vector.broadcast %cst_11 : f32 to vector<8x128xf32>
    %16 = arith.maximumf %14, %15 : vector<8x128xf32>
    %c0_12 = arith.constant 0 : index
    %c0_13 = arith.constant 0 : index
    %17 = vector.load %arg6[%c0_12, %c0_13] : memref<8x128xf32, #tpu.memory_space<vmem>>, vector<8x128xf32>
    tpu.vector_store %arg6[%c0_12, %c0_13], %16 {strides = array<i32>} : memref<8x128xf32, #tpu.memory_space<vmem>>, vector<8x128xf32>,
    return
  }
  func.func @transform_0(%arg0: i32) -> (i32, i32) {
    %c0_i32 = arith.constant 0 : i32
    %c0_i32_0 = arith.constant 0 : i32
    return %arg0, %c0_i32 : i32, i32
  }
  func.func @transform_1(%arg0: i32) -> (i32, i32) {
    %c0_i32 = arith.constant 0 : i32
    %c0_i32_0 = arith.constant 0 : i32
    %c0_i32_1 = arith.constant 0 : i32
    return %c0_i32, %c0_i32_0 : i32, i32
  }
  func.func @transform_2(%arg0: i32) -> (i32, i32) {
    %c0_i32 = arith.constant 0 : i32
    %c0_i32_0 = arith.constant 0 : i32
    %c0_i32_1 = arith.constant 0 : i32
    return %c0_i32, %c0_i32_0 : i32, i32
  }
  func.func @transform_3(%arg0: i32) -> (i32, i32) {
    %c0_i32 = arith.constant 0 : i32
    %c0_i32_0 = arith.constant 0 : i32
    %c0_i32_1 = arith.constant 0 : i32
    return %c0_i32, %c0_i32_0 : i32, i32
  }
  func.func @transform_4(%arg0: i32) -> (i32, i32) {
    %c0_i32 = arith.constant 0 : i32
    %c0_i32_0 = arith.constant 0 : i32
    %c0_i32_1 = arith.constant 0 : i32
    return %c0_i32, %c0_i32_0 : i32, i32
  }
  func.func @transform_5(%arg0: i32) -> (i32, i32) {
    %c0_i32 = arith.constant 0 : i32
    %c0_i32_0 = arith.constant 0 : i32
    return %arg0, %c0_i32 : i32, i32
  }
}

</mosaic_0001>

<bundles_post_ra>
// kernel: digitalnn_forward.1
= control target key start
LH: loop header
LB: loop body
LE: loop exit
PB: predicated region body
PF: predicated region fallthrough
CT: control target
= control target key end

     0   :  { %10 = vsyncpa [#allocation3], 0  ;;  %s569_s18 = smov [#allocation2]   ;;  %s677_s0 = inlined_call_operand.vmem [shape: f32[8,192], index: 0, kind: input, shape index: {}]   ;;  %s678_s1 = inlined_call_operand.hbm [shape: bf16[192,256], index: 1, kind: input, shape index: {}]   ;;  %s679_s2 = inlined_call_operand.vmem [shape: f32[1,256], index: 2, kind: input, shape index: {}]   ;;  %s680_s3 = inlined_call_operand.vmem [shape: bf16[256,128], index: 3, kind: input, shape index: {}]   ;;  %s681_s4 = inlined_call_operand.vmem [shape: f32[1,128], index: 4, kind: input, shape index: {}]   ;;  %s682_s5 = inlined_call_operand.vmem [shape: f32[8,128], index: 5, kind: output, shape index: {}]  }
   0x1   :  { %s18_s19 = sshll.u32 %s569_s18, 4  ;;  %s545_s22 = scalar_lea.hbm %s678_s1, 3072  ;;  %s19_s19 = int_to_ptr.vmem [resolvable:$true] %s18_s19 }
   0x2   :  { %p546_p0 = scmp.ne.s32.totalorder %s678_s1, %s545_s22  ;;  %p549_p1 = scmp.lt.u32.totalorder %s545_s22, %s678_s1 }
   0x4   :  { %p551_p2 = pnand %p549_p1, %p546_p0 }
   0x6   :  { %554 = shalt.err (!%p551_p2)
}
   0x7   :  { %s555_s27 = scalar_lea.vmem %s19_s19, 3072  ;;  %p560_p4 = scmp.lt.s32.totalorder %s19_s19, %s19_s19 }
   0x8   :  { %p556_p3 = scmp.ne.s32.totalorder %s19_s19, %s555_s27  ;;  %p561_p5 = scmp.lt.s32.totalorder %s555_s27, %s555_s27 }
   0xa   :  { %p562_p6 = por %p561_p5, %p560_p4 }
   0xc   :  { %p563_p7 = pnand %p562_p6, %p556_p3 }
   0xe   :  { %566 = shalt.err (!%p563_p7)
}
   0xf   :  { %s570_s28 = smov 128   ;;  %s571_s29 = smov 8  }
  0x10   :  { %24 = dma.hbm_to_vmem [thread:$0]  %s678_s1, 3072, %s19_s19, [#allocation3], %s570_s28, %s570_s28, %s571_s29  }
  0x11   :  { %567 = dma.done.wait [#allocation3], 3072  }
  0x12   :  { %568 = vsyncadd [#allocation3], 4294964224  ;;  %v493_v0 = vld [vmem:[#allocation2 + $0x4] ss:$8 sps:$4 sm:$0xff]   ;;  %v495_v1 = vld [vmem:[#allocation2] ss:$8 sps:$4 sm:$0xff]   ;;  %v65_v44 = vlaneseq }
  0x13   :  { %199 = vmatprep.subr.bf16.mxu0 %v493_v0  ;;  %v496_v2 = vld [vmem:[#allocation2 + $0x14] ss:$8 sps:$4 sm:$0xff]   ;;  %v498_v3 = vld [vmem:[#allocation2 + $0x10] ss:$8 sps:$4 sm:$0xff]   ;;  %v499_v4 = vld [vmem:[#allocation2 + $0x24] ss:$8 sps:$4 sm:$0xff]  }
  0x14   :  { %200 = vmatpush1.bf16.msra.mxu0 %v495_v1  ;;  %v501_v5 = vld [vmem:[#allocation2 + $0x20] ss:$8 sps:$4 sm:$0xff]   ;;  %v502_v6 = vld [vmem:[#allocation2 + $0x34] ss:$8 sps:$4 sm:$0xff]   ;;  %v504_v7 = vld [vmem:[#allocation2 + $0x30] ss:$8 sps:$4 sm:$0xff]  }
  0x15   :  { %201 = vmatprep.subr.bf16.mxu0 %v496_v2  ;;  %v505_v8 = vld [vmem:[#allocation2 + $0x44] ss:$8 sps:$4 sm:$0xff]   ;;  %v507_v9 = vld [vmem:[#allocation2 + $0x40] ss:$8 sps:$4 sm:$0xff]   ;;  %v508_v10 = vld [vmem:[#allocation2 + $0x54] ss:$8 sps:$4 sm:$0xff]  }
  0x16   :  { %v36_v11 = vld [vmem:[%s677_s0 + $0x8] sm:$0xff]  ;;  %vm195_vm0 = vcmask 523264   ;;  %v510_v12 = vld [vmem:[#allocation2 + $0x50] ss:$8 sps:$4 sm:$0xff]   ;;  %v529_v14 = vld [vmem:[%s680_s3 + $0x40] sm:$0xff]   ;;  %v66_v45 = vshrl.u32 %v65_v44, 7 }
  0x17   :  { %v38_v13 = vpack.c.bf16 %v36_v11, %v36_v11  ;;  %v530_v15 = vld [vmem:[%s680_s3] sm:$0xff]   ;;  %v531_v16 = vld [vmem:[%s680_s3 + $0x48] sm:$0xff]   ;;  %468 = vmatprep.subr.bf16.mxu1 %v529_v14  ;;  %v533_v19 = vld [vmem:[%s680_s3 + $0x50] sm:$0xff]  }
  0x18   :  { %202 = vmatpush1.bf16.msra.mxu0 %v498_v3  ;;  %v511_v17 = vld [vmem:[#allocation2 + $0x64] ss:$8 sps:$4 sm:$0xff]   ;;  %469 = vmatpush3.bf16.msra.mxu1 %v530_v15  ;;  %v513_v20 = vld [vmem:[#allocation2 + $0x60] ss:$8 sps:$4 sm:$0xff]   ;;  %v514_v21 = vld [vmem:[#allocation2 + $0x74] ss:$8 sps:$4 sm:$0xff]  }
  0x19   :  { %203 = vmatprep.subr.bf16.mxu0 %v499_v4  ;;  %450 = vmatprep.mubr.msk.bf16.mxu0 %vm195_vm0, %v38_v13  ;;  %v532_v18 = vld [vmem:[%s680_s3 + $0x8] sm:$0xff]   ;;  %v516_v22 = vld [vmem:[#allocation2 + $0x70] ss:$8 sps:$4 sm:$0xff]   ;;  %v537_v27 = vld [vmem:[%s680_s3 + $0x60] sm:$0xff]   ;;  %v67_v46 = vsub.s32 0, %v66_v45  ;;  %v71_v48 = vsub.s32 1, %v66_v45 }
  0x1a   :  { %470 = vmatprep.subr.bf16.mxu1 %v531_v16  ;;  %v534_v23 = vld [vmem:[%s680_s3 + $0x10] sm:$0xff]   ;;  %v535_v24 = vld [vmem:[%s680_s3 + $0x58] sm:$0xff]   ;;  %v517_v25 = vld [vmem:[#allocation2 + $0x84] ss:$8 sps:$4 sm:$0xff]  }
  0x1b   :  { %v536_v26 = vld [vmem:[%s680_s3 + $0x18] sm:$0xff]   ;;  %v519_v28 = vld [vmem:[#allocation2 + $0x80] ss:$8 sps:$4 sm:$0xff]   ;;  %v523_v33 = vld [vmem:[#allocation2 + $0xa4] ss:$8 sps:$4 sm:$0xff]  }
  0x1c   :  { %204 = vmatpush1.bf16.msra.mxu0 %v501_v5  ;;  %471 = vmatpush3.bf16.msra.mxu1 %v532_v18  ;;  %v520_v29 = vld [vmem:[#allocation2 + $0x94] ss:$8 sps:$4 sm:$0xff]   ;;  %v538_v30 = vld [vmem:[%s680_s3 + $0x20] sm:$0xff]   ;;  %v539_v31 = vld [vmem:[%s680_s3 + $0x68] sm:$0xff]  }
  0x1d   :  { %205 = vmatprep.subr.bf16.mxu0 %v502_v6  ;;  %472 = vmatprep.subr.bf16.mxu1 %v533_v19  ;;  %v522_v32 = vld [vmem:[#allocation2 + $0x90] ss:$8 sps:$4 sm:$0xff]   ;;  %v540_v34 = vld [vmem:[%s680_s3 + $0x28] sm:$0xff]   ;;  %v526_v36 = vld [vmem:[#allocation2 + $0xb4] ss:$8 sps:$4 sm:$0xff]  }
  0x1e   :  { %v525_v35 = vld [vmem:[#allocation2 + $0xa0] ss:$8 sps:$4 sm:$0xff]   ;;  %v528_v37 = vld [vmem:[#allocation2 + $0xb0] ss:$8 sps:$4 sm:$0xff]  }
  0x1f   :  { %v35_v38 = vld [vmem:[%s677_s0] sm:$0xff]  ;;  %v541_v40 = vld [vmem:[%s680_s3 + $0x70] sm:$0xff]   ;;  %v543_v42 = vld [vmem:[%s680_s3 + $0x78] sm:$0xff]  }
  0x20   :  { %206 = vmatpush1.bf16.msra.mxu0 %v504_v7  ;;  %473 = vmatpush3.bf16.msra.mxu1 %v534_v23  ;;  %v37_v39 = vpack.c.bf16 %v35_v38, %v35_v38  ;;  %v542_v41 = vld [vmem:[%s680_s3 + $0x30] sm:$0xff]   ;;  %v544_v43 = vld [vmem:[%s680_s3 + $0x38] sm:$0xff]   ;;  %v63_v47 = vld [vmem:[%s679_s2] sm:$0x3] }
  0x21   :  { %207 = vmatprep.subr.bf16.mxu0 %v505_v8  ;;  %474 = vmatprep.subr.bf16.mxu1 %v535_v24  ;;  %v68_v49 = vrot.slane %v63_v47, %v67_v46  ;;  %v72_v50 = vrot.slane %v63_v47, %v71_v48  ;;  %v451_v62 = vld [vmem:[%s681_s4] ss:$0 sm:$0xff] }
  0x24   :  { %208 = vmatpush1.bf16.msra.mxu0 %v507_v9  ;;  %475 = vmatpush3.bf16.msra.mxu1 %v536_v26 }
  0x25   :  { %209 = vmatprep.subr.bf16.mxu0 %v508_v10  ;;  %476 = vmatprep.subr.bf16.mxu1 %v537_v27 }
  0x28   :  { %210 = vmatpush1.bf16.msra.mxu0 %v510_v12  ;;  %477 = vmatpush3.bf16.msra.mxu1 %v538_v30 }
  0x29   :  { %211 = vmatprep.subr.bf16.mxu0 %v511_v17  ;;  %478 = vmatprep.subr.bf16.mxu1 %v539_v31 }
  0x2c   :  { %212 = vmatpush1.bf16.msra.mxu0 %v513_v20  ;;  %479 = vmatpush3.bf16.msra.mxu1 %v540_v34 }
  0x2d   :  { %213 = vmatprep.subr.bf16.mxu0 %v514_v21  ;;  %480 = vmatprep.subr.bf16.mxu1 %v541_v40 }
  0x30   :  { %214 = vmatpush1.bf16.msra.mxu0 %v516_v22  ;;  %481 = vmatpush3.bf16.msra.mxu1 %v542_v41 }
  0x31   :  { %215 = vmatprep.subr.bf16.mxu0 %v517_v25  ;;  %482 = vmatprep.subr.bf16.mxu1 %v543_v42 }
  0x34   :  { %216 = vmatpush1.bf16.msra.mxu0 %v519_v28  ;;  %483 = vmatpush3.bf16.msra.mxu1 %v544_v43 }
  0x35   :  { %217 = vmatprep.subr.bf16.mxu0 %v520_v29 }
  0x38   :  { %218 = vmatpush1.bf16.msra.mxu0 %v522_v32 }
  0x39   :  { %219 = vmatprep.subr.bf16.mxu0 %v523_v33 }
  0x3c   :  { %220 = vmatpush1.bf16.msra.mxu0 %v525_v35 }
  0x3d   :  { %221 = vmatprep.subr.bf16.mxu0 %v526_v36 }
  0x40   :  { %222 = vmatpush1.bf16.msra.mxu0 %v528_v37 }
  0x43   :  { %232 = vmatmul.mubr.bf16.vlgmr.msra.gmra.mrb[0].mxu0 %v37_v39 }
 0x116   :  { %v233_v51 = vpop.f32.mrb[0].mxu0 }
 0x117   :  { %v234_v52 = vadd.f32 %v233_v51, %v68_v49  ;;  %v235_v53 = vpop.f32.mrb[1].mxu0 }
 0x118   :  { %v236_v54 = vadd.f32 %v235_v53, %v72_v50  ;;  %v237_v55 = vpop.f32.mrb[2].mxu0 }
 0x119   :  { %v240_v56 = vmax.f32 %v234_v52, 0.0  ;;  %v238_v57 = vpop.f32.mrb[3].mxu0 }
 0x11a   :  { %v241_v58 = vmax.f32 %v236_v54, 0.0 }
 0x11b   :  { %v242_v60 = vpack.c.bf16 %v240_v56, %v240_v56 }
 0x11c   :  { %v243_v59 = vpack.c.bf16 %v241_v58, %v241_v58 }
 0x11e   :  { %411 = vmatprep.mubr.bf16.mxu1 %v243_v59 }
 0x11f   :  { %412 = vmatmul.mubr.bf16.vlgmr.msra.gmra.mrb[0].mxu1 %v242_v60 }
 0x1f2   :  { %v484_v61 = vpop.f32.mrb[0].mxu1 }
 0x1f3   :  { %v485_v63 = vpop.f32.mrb[1].mxu1 }
 0x1f4   :  { %v486_v0 = vadd.f32 %v485_v63, %v484_v61  ;;  %v487_v1 = vpop.f32.mrb[2].mxu1 }
 0x1f5   :  { %v488_v2 = vpop.f32.mrb[3].mxu1 }
 0x1f6   :  { %v414_v3 = vadd.f32 %v486_v0, %v451_v62 }
 0x1f8   :  { %v419_v4 = vmax.f32 %v414_v3, 0.0 }
 0x1fa   :  { %420 = vst [vmem:[%s682_s5] sm:$0xff] %v419_v4 }
 0x1fb   :  { %425 = vsyncpa [#allocation3], 1 }

</bundles_post_ra>
